<compile_context>
chip_gen: v7x
topology: tpu7x:2x2x1
jax: 0.10.0
libtpu: 0.0.40
codegen_flags: <defaults>
</compile_context>

<pallas_src>
import jax
import jax.numpy as jnp
from jax.experimental import pallas as pl
from jax.experimental.pallas import tpu as pltpu


_TARGET_BLOCK_ELEMS = 512 * 1024   # ~2 MiB of f32 per pipelined block


# ---------------------------------------------------------------------------
# Kernels
# ---------------------------------------------------------------------------

def _make_halo_kernel(inv, width):
    """Kernel for an H-tile: center (TH, W) plus 8-row wrap halos above/below."""
    four_inv = 4.0 * inv

    def kernel(up_ref, c_ref, dn_ref, o_ref):
        c = c_ref[...]                                  # (TH, W)
        top = up_ref[7:8, :]                            # periodic row above c[0]
        bot = dn_ref[0:1, :]                            # periodic row below c[-1]
        # Vertical neighbors via shifted slices (no sublane rolls).
        up = jnp.concatenate([top, c[:-1, :]], axis=0)  # x[i-1, j]
        dn = jnp.concatenate([c[1:, :], bot], axis=0)   # x[i+1, j]
        # Horizontal neighbors: lane rotations on the XLU.
        lt = pltpu.roll(c, 1, axis=1)                   # x[i, j-1]
        rt = pltpu.roll(c, width - 1, axis=1)           # x[i, j+1]
        o_ref[...] = inv * (up + dn + lt + rt) - four_inv * c

    return kernel


def _make_plane_kernel(inv):
    """Kernel for a block of TB whole planes (TB, H, W): wrap via rolls."""
    four_inv = 4.0 * inv

    def kernel(x_ref, o_ref):
        x = x_ref[...]                                   # (TB, H, W)
        vert = jnp.roll(x, 1, axis=1) + jnp.roll(x, -1, axis=1)
        horz = jnp.roll(x, 1, axis=2) + jnp.roll(x, -1, axis=2)
        o_ref[...] = inv * (vert + horz) - four_inv * x

    return kernel


# ---------------------------------------------------------------------------
# Tiling helpers
# ---------------------------------------------------------------------------

def _choose_th(H, W):
    """Largest multiple-of-8 divisor of H with TH*W <= target (>= 8)."""
    cap = max(8, _TARGET_BLOCK_ELEMS // max(W, 1))
    best = 8
    th = 8
    limit = min(H, cap)
    while th <= limit:
        if H % th == 0:
            best = th
        th += 8
    return best


def _choose_tb(B, plane_elems):
    """Largest divisor of B with TB*plane <= target (>= 1)."""
    cap = max(1, _TARGET_BLOCK_ELEMS // max(plane_elems, 1))
    best = 1
    for d in range(1, min(B, cap) + 1):
        if B % d == 0:
            best = d
    return best


# ---------------------------------------------------------------------------
# Pallas call wrappers
# ---------------------------------------------------------------------------

def _laplacian_tiled(x, inv):
    """H-tiled halo path (requires H % 8 == 0)."""
    B, H, W = x.shape
    TH = _choose_th(H, W)
    x2 = x.reshape(B * H, W)
    num_tiles = (B * H) // TH

    def center_map(t):
        return (t, 0)

    def up_map(t):
        b = (t * TH) // H
        r0 = (t * TH) % H
        row = b * H + (r0 - 1) % H        # wrap row above the tile
        return (row // 8, 0)              # 8-row halo block; row is its last row

    def dn_map(t):
        b = (t * TH) // H
        r0 = (t * TH) % H
        row = b * H + (r0 + TH) % H       # wrap row below the tile
        return (row // 8, 0)              # 8-row halo block; row is its first row

    out = pl.pallas_call(
        _make_halo_kernel(inv, W),
        out_shape=jax.ShapeDtypeStruct((B * H, W), jnp.float32),
        grid_spec=pltpu.PrefetchScalarGridSpec(
            num_scalar_prefetch=0,
            grid=(num_tiles,),
            in_specs=[
                pl.BlockSpec((8, W), up_map),       # halo above
                pl.BlockSpec((TH, W), center_map),  # center tile
                pl.BlockSpec((8, W), dn_map),       # halo below
            ],
            out_specs=pl.BlockSpec((TH, W), center_map),
        ),
        compiler_params=pltpu.CompilerParams(
            dimension_semantics=("parallel",)),
    )(x2, x2, x2)
    return out.reshape(B, H, W)


def _laplacian_planes(x, inv):
    """Batched whole-plane path (small planes, or H not a multiple of 8)."""
    B, H, W = x.shape
    TB = _choose_tb(B, H * W)
    # TODO(synk): planes with H % 8 != 0 whose size exceeds the ~2 MiB target
    # are not H-tiled (halo tiling needs 8-row alignment); they fall back to
    # one full plane per block.
    out = pl.pallas_call(
        _make_plane_kernel(inv),
        out_shape=jax.ShapeDtypeStruct((B, H, W), jnp.float32),
        grid_spec=pltpu.PrefetchScalarGridSpec(
            num_scalar_prefetch=0,
            grid=(B // TB,),
            in_specs=[pl.BlockSpec((TB, H, W), lambda b: (b, 0, 0))],
            out_specs=pl.BlockSpec((TB, H, W), lambda b: (b, 0, 0)),
        ),
        compiler_params=pltpu.CompilerParams(
            dimension_semantics=("parallel",)),
    )(x)
    return out


def laplacian(inputs, dx=1.0, dy=1.0):
    """Pallas equivalent of LaplacianOp.forward.

    inputs: [B, H, W] or [H, W] float32; dx, dy: static Python floats.
    Returns the periodic 5-point Laplacian scaled by 1/(dx*dy), same shape.
    """
    x = jnp.asarray(inputs, jnp.float32)
    unsqueezed = x.ndim == 2
    if unsqueezed:
        x = x[None]
    B, H, W = x.shape
    inv = 1.0 / (float(dx) * float(dy))

    if H % 8 == 0 and H * W > _TARGET_BLOCK_ELEMS:
        out = _laplacian_tiled(x, inv)
    else:
        out = _laplacian_planes(x, inv)

    return out[0] if unsqueezed else out


# ---------------------------------------------------------------------------
# Pure-JAX reference (matches the torch module)
# ---------------------------------------------------------------------------

def _reference(x, dx=1.0, dy=1.0):
    lap = (jnp.roll(x, 1, axis=-2) + jnp.roll(x, -1, axis=-2)
           + jnp.roll(x, 1, axis=-1) + jnp.roll(x, -1, axis=-1)
           - 4.0 * x) / (dx * dy)
    return lap


if __name__ == "__main__":
    key = jax.random.PRNGKey(0)
    k1, k2 = jax.random.split(key)

    dx, dy = 1.0, 0.5

    # 1) Small batched planes -> batched-plane path (TB batches per block).
    x_small = jax.random.normal(k1, (2, 16, 16), dtype=jnp.float32)
    out_small = jax.block_until_ready(laplacian(x_small, dx, dy))
    ref_small = _reference(x_small, dx, dy)
    assert out_small.shape == x_small.shape
    assert jnp.allclose(out_small, ref_small, atol=1e-5, rtol=1e-5)

    # 2) 2-D input (unsqueeze/squeeze path).
    out_2d = jax.block_until_ready(laplacian(x_small[0], dx, dy))
    assert out_2d.shape == x_small[0].shape
    assert jnp.allclose(out_2d, ref_small[0], atol=1e-5, rtol=1e-5)

    # 3) Larger planes -> H-tiled halo path; tiles cross the batch boundary
    #    and exercise the periodic wrap rows fetched as halo blocks.
    x_big = jax.random.normal(k2, (2, 256, 2176), dtype=jnp.float32)
    out_big = jax.block_until_ready(laplacian(x_big, dx, dy))
    ref_big = _reference(x_big, dx, dy)
    assert out_big.shape == x_big.shape
    assert jnp.allclose(out_big, ref_big, atol=1e-5, rtol=1e-5)

    print("KERNEL_OK")
</pallas_src>

<mosaic_0001>
module attributes {stable_mosaic.version = 11 : i64} {
  func.func @kernel(%arg0: i32, %arg1: memref<2x16x16xf32, #tpu.memory_space<vmem>>, %arg2: memref<2x16x16xf32, #tpu.memory_space<vmem>>) attributes {dimension_semantics = [#tpu.dimension_semantics<parallel>], iteration_bounds = array<i64: 1>, scalar_prefetch = 0 : i64, scratch_operands = 0 : i64, tpu.core_type = #tpu.core_type<tc>, window_params = [{transform_indices = @transform_0, window_bounds = array<i64: 2, 16, 16>}, {transform_indices = @transform_1, window_bounds = array<i64: 2, 16, 16>}]} {
    %c0 = arith.constant 0 : index
    %c0_0 = arith.constant 0 : index
    %c0_1 = arith.constant 0 : index
    %0 = vector.load %arg1[%c0, %c0_0, %c0_1] : memref<2x16x16xf32, #tpu.memory_space<vmem>>, vector<2x16x16xf32>
    %1 = vector.extract_strided_slice %0 {offsets = [0, 15, 0], sizes = [2, 1, 16], strides = [1, 1, 1]} : vector<2x16x16xf32> to vector<2x1x16xf32>
    %2 = vector.extract_strided_slice %0 {offsets = [0, 0, 0], sizes = [2, 15, 16], strides = [1, 1, 1]} : vector<2x16x16xf32> to vector<2x15x16xf32>
    %3 = tpu.concatenate %1, %2 in 1 : vector<2x1x16xf32>, vector<2x15x16xf32> -> vector<2x16x16xf32>
    %4 = vector.extract_strided_slice %0 {offsets = [0, 1, 0], sizes = [2, 15, 16], strides = [1, 1, 1]} : vector<2x16x16xf32> to vector<2x15x16xf32>
    %5 = vector.extract_strided_slice %0 {offsets = [0, 0, 0], sizes = [2, 1, 16], strides = [1, 1, 1]} : vector<2x16x16xf32> to vector<2x1x16xf32>
    %6 = tpu.concatenate %4, %5 in 1 : vector<2x15x16xf32>, vector<2x1x16xf32> -> vector<2x16x16xf32>
    %7 = arith.addf %3, %6 : vector<2x16x16xf32>
    %8 = vector.extract_strided_slice %0 {offsets = [0, 0, 15], sizes = [2, 16, 1], strides = [1, 1, 1]} : vector<2x16x16xf32> to vector<2x16x1xf32>
    %9 = vector.extract_strided_slice %0 {offsets = [0, 0, 0], sizes = [2, 16, 15], strides = [1, 1, 1]} : vector<2x16x16xf32> to vector<2x16x15xf32>
    %10 = tpu.concatenate %8, %9 in 2 : vector<2x16x1xf32>, vector<2x16x15xf32> -> vector<2x16x16xf32>
    %11 = vector.extract_strided_slice %0 {offsets = [0, 0, 1], sizes = [2, 16, 15], strides = [1, 1, 1]} : vector<2x16x16xf32> to vector<2x16x15xf32>
    %12 = vector.extract_strided_slice %0 {offsets = [0, 0, 0], sizes = [2, 16, 1], strides = [1, 1, 1]} : vector<2x16x16xf32> to vector<2x16x1xf32>
    %13 = tpu.concatenate %11, %12 in 2 : vector<2x16x15xf32>, vector<2x16x1xf32> -> vector<2x16x16xf32>
    %14 = arith.addf %10, %13 : vector<2x16x16xf32>
    %15 = arith.addf %7, %14 : vector<2x16x16xf32>
    %cst = arith.constant 2.000000e+00 : f32
    %16 = vector.broadcast %cst : f32 to vector<2x16x16xf32>
    %17 = arith.mulf %16, %15 : vector<2x16x16xf32>
    %cst_2 = arith.constant 8.000000e+00 : f32
    %18 = vector.broadcast %cst_2 : f32 to vector<2x16x16xf32>
    %19 = arith.mulf %18, %0 : vector<2x16x16xf32>
    %20 = arith.subf %17, %19 : vector<2x16x16xf32>
    %c0_3 = arith.constant 0 : index
    %c0_4 = arith.constant 0 : index
    %c0_5 = arith.constant 0 : index
    %21 = vector.load %arg2[%c0_3, %c0_4, %c0_5] : memref<2x16x16xf32, #tpu.memory_space<vmem>>, vector<2x16x16xf32>
    tpu.vector_store %arg2[%c0_3, %c0_4, %c0_5], %20 {strides = array<i32>} : memref<2x16x16xf32, #tpu.memory_space<vmem>>, vector<2x16x16xf32>,
    return
  }
  func.func @transform_0(%arg0: i32) -> (i32, i32, i32) {
    %c0_i32 = arith.constant 0 : i32
    %c0_i32_0 = arith.constant 0 : i32
    %c0_i32_1 = arith.constant 0 : i32
    return %arg0, %c0_i32, %c0_i32_0 : i32, i32, i32
  }
  func.func @transform_1(%arg0: i32) -> (i32, i32, i32) {
    %c0_i32 = arith.constant 0 : i32
    %c0_i32_0 = arith.constant 0 : i32
    %c0_i32_1 = arith.constant 0 : i32
    return %arg0, %c0_i32, %c0_i32_0 : i32, i32, i32
  }
}

</mosaic_0001>

<bundles_post_ra>
// kernel: tpu_custom_call.1
= control target key start
LH: loop header
LB: loop body
LE: loop exit
PB: predicated region body
PF: predicated region fallthrough
CT: control target
= control target key end

     0   :  { %6 = vsyncpa [#allocation3], 0  ;;  %s321_s0 = inlined_call_operand.hbm [shape: f32[2,16,16], index: 0, kind: input, shape index: {}]   ;;  %s322_s1 = inlined_call_operand.hbm [shape: f32[2,16,16], index: 1, kind: output, shape index: {}]  }
   0x1   :  { %7 = vsyncpa [#allocation4], 0  ;;  %s221_s6 = smov [#allocation2]   ;;  %s173_s10 = scalar_lea.hbm %s321_s0, 512 }
   0x2   :  { %s13_s7 = sshll.u32 %s221_s6, 4  ;;  %p174_p0 = scmp.ne.s32.totalorder %s321_s0, %s173_s10  ;;  %s14_s7 = int_to_ptr.vmem [resolvable:$true] %s13_s7 }
   0x3   :  { %p177_p1 = scmp.lt.u32.totalorder %s173_s10, %s321_s0 }
   0x5   :  { %p179_p2 = pnand %p177_p1, %p174_p0 }
   0x7   :  { %182 = shalt.err (!%p179_p2)
}
   0x8   :  { %s183_s15 = scalar_lea.vmem %s14_s7, 512  ;;  %p188_p4 = scmp.lt.s32.totalorder %s14_s7, %s14_s7 }
   0x9   :  { %p184_p3 = scmp.ne.s32.totalorder %s14_s7, %s183_s15  ;;  %p189_p5 = scmp.lt.s32.totalorder %s183_s15, %s183_s15 }
   0xb   :  { %p190_p6 = por %p189_p5, %p188_p4 }
   0xd   :  { %p191_p7 = pnand %p190_p6, %p184_p3 }
   0xf   :  { %194 = shalt.err (!%p191_p7)
}
  0x10   :  { %s222_s16 = smov 128   ;;  %s223_s17 = smov 8  }
  0x11   :  { %19 = dma.hbm_to_vmem [thread:$0]  %s321_s0, 512, %s14_s7, [#allocation3], %s222_s16, %s222_s16, %s223_s17  }
  0x12   :  { %217 = dma.done.wait [#allocation3], 512  }
  0x13   :  { %218 = vsyncadd [#allocation3], 4294966784  ;;  %v254_v0 = vld [vmem:[#allocation2 + $0x10] sm:$0xff]  ;;  %v256_v1 = vld [vmem:[#allocation2] sm:$0xff]  ;;  %s224_s20 = smov 113   ;;  %s225_s0 = smov 1  }
  0x14   :  { %69 = vrot.lane.b32.xlu1 %v254_v0, %s224_s20  ;;  %65 = vrot.lane.b32.xlu0 %v256_v1, %s224_s20  ;;  %v260_v2 = vld [vmem:[#allocation2 + $0x18] sm:$0xff]  ;;  %v262_v3 = vld [vmem:[#allocation2 + $0x8] sm:$0xff]  ;;  %vm35_vm0 = vcmask 1040384   ;;  %vm46_vm1 = vcmask 1046528   ;;  %v36_v5 = vrot.slane %v256_v1, 7  ;;  %v47_v6 = vrot.slane %v256_v1, 1 }
  0x15   :  { %v29_v4 = vrot.slane %v262_v3, 7  ;;  %v48_v7 = vrot.slane %v262_v3, 1  ;;  %v30_v14 = vrot.slane %v260_v2, 7  ;;  %v38_v15 = vrot.slane %v254_v0, 7  ;;  %s226_s21 = smov 127   ;;  %s227_s22 = smov 15  }
  0x16   :  { %v50_v16 = vrot.slane %v254_v0, 1  ;;  %v51_v17 = vrot.slane %v260_v2, 1  ;;  %vm89_vm2 = vcmask 7168   ;;  %vm118_vm3 = vcmask 121856   ;;  %s228_s23 = smov [#allocation5]  }
  0x17   :  { %v37_v8 = vsel %vm35_vm0, %v36_v5, %v29_v4  ;;  %v59_v9 = vsel %vm46_vm1, %v48_v7, %v47_v6  ;;  %v44_v10 = vsel %vm35_vm0, %v29_v4, %v36_v5  ;;  %v49_v11 = vsel %vm46_vm1, %v47_v6, %v48_v7  ;;  %s153_s24 = sshll.u32 %s228_s23, 4  ;;  %s154_s24 = int_to_ptr.vmem [resolvable:$true] %s153_s24 }
  0x18   :  { %71 = vrot.lane.b32.xlu1 %v260_v2, %s224_s20  ;;  %67 = vrot.lane.b32.xlu0 %v262_v3, %s224_s20  ;;  %v62_v12 = vadd.f32 %v59_v9, %v37_v8  ;;  %v61_v13 = vadd.f32 %v49_v11, %v44_v10  ;;  %v39_v18 = vsel %vm35_vm0, %v38_v15, %v30_v14  ;;  %v136_v45 = vmul.f32 8.0, %v262_v3  ;;  %s195_s25 = scalar_lea.vmem %s154_s24, 512  ;;  %p200_p9 = scmp.lt.s32.totalorder %s154_s24, %s154_s24 }
  0x19   :  { %v60_v19 = vsel %vm46_vm1, %v51_v17, %v50_v16  ;;  %v45_v20 = vsel %vm35_vm0, %v30_v14, %v38_v15  ;;  %v52_v21 = vsel %vm46_vm1, %v50_v16, %v51_v17  ;;  %v135_v47 = vmul.f32 8.0, %v256_v1  ;;  %p196_p8 = scmp.ne.s32.totalorder %s154_s24, %s195_s25  ;;  %p201_p10 = scmp.lt.s32.totalorder %s195_s25, %s195_s25 }
  0x1a   :  { %v64_v22 = vadd.f32 %v60_v19, %v39_v18  ;;  %v63_v23 = vadd.f32 %v52_v21, %v45_v20  ;;  %v138_v58 = vmul.f32 8.0, %v260_v2  ;;  %v137_v59 = vmul.f32 8.0, %v254_v0 }
  0x1b   :  { %vm143_vm4 = vcmask 130048   ;;  %p202_p11 = por %p201_p10, %p200_p9 }
  0x1c   :  { %79 = vrot.lane.b32.xlu1 %v262_v3, %s225_s0  ;;  %77 = vrot.lane.b32.xlu0 %v256_v1, %s225_s0 }
  0x1d   :  { %p203_p12 = pnand %p202_p11, %p196_p8 }
  0x20   :  { %83 = vrot.lane.b32.xlu1 %v260_v2, %s225_s0  ;;  %81 = vrot.lane.b32.xlu0 %v254_v0, %s225_s0 }
  0x24   :  { %96 = vrot.lane.b32.xlu1 %v262_v3, %s226_s21  ;;  %94 = vrot.lane.b32.xlu0 %v256_v1, %s226_s21 }
  0x28   :  { %100 = vrot.lane.b32.xlu1 %v260_v2, %s226_s21  ;;  %98 = vrot.lane.b32.xlu0 %v254_v0, %s226_s21 }
  0x2c   :  { %108 = vrot.lane.b32.xlu1 %v262_v3, %s227_s22  ;;  %106 = vrot.lane.b32.xlu0 %v256_v1, %s227_s22 }
  0x30   :  { %112 = vrot.lane.b32.xlu1 %v260_v2, %s227_s22  ;;  %110 = vrot.lane.b32.xlu0 %v254_v0, %s227_s22 }
  0x86   :  { %v70_v24 = vpop.permute.xlu1 %69  ;;  %v66_v25 = vpop.permute.xlu0 %65 }
  0x8a   :  { %v72_v26 = vpop.permute.xlu1 %71  ;;  %v68_v27 = vpop.permute.xlu0 %67 }
  0x8e   :  { %v80_v28 = vpop.permute.xlu1 %79  ;;  %v78_v29 = vpop.permute.xlu0 %77 }
  0x8f   :  { %v91_v38 = vsel %vm89_vm2, %v68_v27, %v80_v28  ;;  %v90_v39 = vsel %vm89_vm2, %v66_v25, %v78_v29 }
  0x92   :  { %v84_v30 = vpop.permute.xlu1 %83  ;;  %v82_v31 = vpop.permute.xlu0 %81 }
  0x93   :  { %v93_v50 = vsel %vm89_vm2, %v72_v26, %v84_v30  ;;  %v92_v51 = vsel %vm89_vm2, %v70_v24, %v82_v31 }
  0x96   :  { %v97_v32 = vpop.permute.xlu1 %96  ;;  %v95_v33 = vpop.permute.xlu0 %94 }
  0x9a   :  { %v101_v34 = vpop.permute.xlu1 %100  ;;  %v99_v35 = vpop.permute.xlu0 %98 }
  0x9e   :  { %v109_v36 = vpop.permute.xlu1 %108  ;;  %v107_v37 = vpop.permute.xlu0 %106 }
  0x9f   :  { %v120_v40 = vsel %vm118_vm3, %v97_v32, %v109_v36  ;;  %v119_v41 = vsel %vm118_vm3, %v95_v33, %v107_v37 }
  0xa0   :  { %v124_v42 = vadd.f32 %v120_v40, %v91_v38  ;;  %v123_v43 = vadd.f32 %v119_v41, %v90_v39 }
  0xa2   :  { %v128_v44 = vadd.f32 %v124_v42, %v62_v12  ;;  %v127_v46 = vadd.f32 %v123_v43, %v61_v13  ;;  %v113_v48 = vpop.permute.xlu1 %112  ;;  %v111_v49 = vpop.permute.xlu0 %110 }
  0xa3   :  { %v122_v52 = vsel %vm118_vm3, %v101_v34, %v113_v48  ;;  %v121_v53 = vsel %vm118_vm3, %v99_v35, %v111_v49 }
  0xa4   :  { %v132_v54 = vmul.f32 2.0, %v128_v44  ;;  %v131_v55 = vmul.f32 2.0, %v127_v46  ;;  %v126_v56 = vadd.f32 %v122_v52, %v93_v50  ;;  %v125_v57 = vadd.f32 %v121_v53, %v92_v51 }
  0xa6   :  { %v140_v60 = vsub.f32 %v132_v54, %v136_v45  ;;  %v139_v61 = vsub.f32 %v131_v55, %v135_v47  ;;  %v130_v62 = vadd.f32 %v126_v56, %v64_v22  ;;  %v129_v63 = vadd.f32 %v125_v57, %v63_v23 }
  0xa8   :  { %v134_v1 = vmul.f32 2.0, %v130_v62  ;;  %v133_v3 = vmul.f32 2.0, %v129_v63  ;;  %144 = vst.msk [vmem:[#allocation5] sm:$0xff] %vm143_vm4, %v139_v61  ;;  %145 = vst.msk [vmem:[#allocation5 + $0x8] sm:$0xff] %vm143_vm4, %v140_v60 }
  0xaa   :  { %v142_v4 = vsub.f32 %v134_v1, %v138_v58  ;;  %v141_v5 = vsub.f32 %v133_v3, %v137_v59 }
  0xac   :  { %146 = vst.msk [vmem:[#allocation5 + $0x10] sm:$0xff] %vm143_vm4, %v141_v5  ;;  %147 = vst.msk [vmem:[#allocation5 + $0x18] sm:$0xff] %vm143_vm4, %v142_v4 }
  0xad   :  { %206 = shalt.err (!%p203_p12)
}
  0xae   :  { %s207_s28 = scalar_lea.hbm %s322_s1, 512 }
  0xaf   :  { %p208_p13 = scmp.ne.s32.totalorder %s322_s1, %s207_s28  ;;  %p211_p0 = scmp.lt.u32.totalorder %s207_s28, %s322_s1 }
  0xb1   :  { %p213_p1 = pnand %p211_p0, %p208_p13 }
  0xb3   :  { %216 = shalt.err (!%p213_p1)
}
  0xb4   :  { %159 = dma.vmem_to_hbm [thread:$0]  %s154_s24, 512, %s322_s1, [#allocation4], %s222_s16, %s222_s16, %s223_s17  }
  0xb5   :  { %219 = dma.done.wait [#allocation4], 512  }
  0xb6   :  { %220 = vsyncadd [#allocation4], 4294966784 }
  0xb7   :  { %163 = vsyncpa [#allocation3], 1 }
  0xb8   :  { %164 = vsyncpa [#allocation4], 1 }

</bundles_post_ra>
